<compile_context>
chip_gen: v5e
topology: v5e:2x2
jax: 0.10.0
libtpu: 0.0.40
codegen_flags: <defaults>
</compile_context>

<pallas_src>
import jax
import jax.numpy as jnp
from jax.experimental import pallas as pl
from jax.experimental.pallas import tpu as pltpu

# ----- small, shape-consistent config -----
B = 2             # batch
S = 8             # sequence length (words)
MAX_CHARS = 16    # chars per word (ELMo uses 50)
CHAR_VOCAB = 262  # ELMo char vocab size
CHAR_EMB = 8      # char embedding dim
F = MAX_CHARS * CHAR_EMB   # flattened per-word char feature dim = 128
D = 128           # output embed dim (ELMo: 1024)
T_TILE_MAX = 256  # max rows per grid step (MXU M fill; v7x-safe at D=1024)


def _round_up(x, m):
    return (x + m - 1) // m * m


def elmo_mix_kernel(mix_ref, feats_ref, w0_ref, w1_ref, w2_ref, out_ref):
    """Fused synthetic-ELMo layer projections + ScalarMix for one token tile.

    mix_ref  : SMEM (3,)   f32   gamma * softmax(scalar_parameters)
    feats_ref: VMEM (T, F) bf16  flattened char features per token
    w0_ref   : VMEM (F, D) bf16  "char-CNN" projection  -> layer 0
    w1_ref   : VMEM (D, D) bf16  "LSTM-1" projection    -> layer 1
    w2_ref   : VMEM (D, D) bf16  "LSTM-2" projection    -> layer 2
    out_ref  : VMEM (T, D) bf16/f32  mixed embedding
    """
    # Hoist the scalar mix weights: one SMEM read / broadcast each.
    m0 = mix_ref[0]
    m1 = mix_ref[1]
    m2 = mix_ref[2]

    # Layer 0 ("char-CNN" projection); bf16 operands on the MXU, f32 accum.
    l0 = jnp.maximum(
        jnp.dot(feats_ref[...], w0_ref[...],
                preferred_element_type=jnp.float32), 0.0)
    # Running ScalarMix accumulator: keeps only acc + the current layer live
    # (vs. three simultaneously-live f32 (T, D) intermediates) and lets the
    # mix VALU work hide under the next matmul instead of the epilogue.
    acc = m0 * l0

    # Layer 1 ("LSTM-1" stand-in).
    l1 = jnp.tanh(
        jnp.dot(l0.astype(jnp.bfloat16), w1_ref[...],
                preferred_element_type=jnp.float32))
    acc = acc + m1 * l1

    # Layer 2 ("LSTM-2" stand-in).
    l2 = jnp.tanh(
        jnp.dot(l1.astype(jnp.bfloat16), w2_ref[...],
                preferred_element_type=jnp.float32))
    acc = acc + m2 * l2

    out_ref[...] = acc.astype(out_ref.dtype)


def _vmem_limit_bytes(t_tile, out_itemsize, weight_buffers):
    """Rough per-call VMEM budget (bytes) with 2x headroom, clamped to a range
    valid on all of v5e/v6e (128 MiB physical) and v7x (64 MiB physical)."""
    w_bytes = (F * D + 2 * D * D) * 2 * weight_buffers          # bf16 weights
    io_bytes = 2 * t_tile * F * 2 + 2 * t_tile * D * out_itemsize  # dbl-buf I/O
    work_bytes = 4 * t_tile * D * 4                              # f32 temps
    budget = 2 * (w_bytes + io_bytes + work_bytes)
    return int(min(max(budget, 16 * 1024 * 1024), 60 * 1024 * 1024))


def _pallas_forward(mix_w, feats, w0b, w1b, w2b, *, t_tile, n_pad, out_dtype,
                    single_buffer_weights, allow_feats_fusion):
    grid = (n_pad // t_tile,)

    if single_buffer_weights:
        # Grid-invariant weights (constant index_map): request a single VMEM
        # buffer instead of the default double buffer.
        def w_spec(shape):
            return pl.BlockSpec(shape, lambda i: (0, 0),
                                pipeline_mode=pl.Buffered(1))
    else:
        def w_spec(shape):
            return pl.BlockSpec(shape, lambda i: (0, 0))

    grid_spec = pltpu.PrefetchScalarGridSpec(
        num_scalar_prefetch=0,
        grid=grid,
        in_specs=[
            pl.BlockSpec(memory_space=pltpu.MemorySpace.SMEM),   # mix weights
            pl.BlockSpec((t_tile, F), lambda i: (i, 0)),         # feats tile
            w_spec((F, D)),                                      # w0 (resident)
            w_spec((D, D)),                                      # w1
            w_spec((D, D)),                                      # w2
        ],
        out_specs=pl.BlockSpec((t_tile, D), lambda i: (i, 0)),
    )

    cp_kwargs = dict(
        dimension_semantics=("parallel",),
        vmem_limit_bytes=_vmem_limit_bytes(
            t_tile, jnp.dtype(out_dtype).itemsize,
            1 if single_buffer_weights else 2),
    )
    if allow_feats_fusion:
        # Let XLA fuse the char-embedding gather / bf16 cast / pad directly
        # into the feats operand (input index 1) instead of materializing it
        # in HBM and re-reading it.
        cp_kwargs["allow_input_fusion"] = [False, True, False, False, False]

    return pl.pallas_call(
        elmo_mix_kernel,
        out_shape=jax.ShapeDtypeStruct((n_pad, D), out_dtype),
        grid_spec=grid_spec,
        compiler_params=pltpu.CompilerParams(**cp_kwargs),
    )(mix_w, feats, w0b, w1b, w2b)


def word_embedding_forward(character_ids, char_table, w0, w1, w2,
                           scalar_params, gamma, out_dtype=jnp.bfloat16):
    """WordEmbedding.forward with only ELMo set.

    character_ids: (B, S, MAX_CHARS) int32 -> (B, S, D) embeddings.
    out_dtype defaults to bf16 (halves output HBM writeback); pass
    jnp.float32 for exact module-dtype fidelity.
    """
    b, s, c = character_ids.shape
    n_tok = b * s

    # glue: char embedding lookup (gather).  The table is cast to bf16 *first*
    # so the gather output (and any feats round-trip when input fusion does
    # not fire) is half the bytes.
    ids_flat = character_ids.reshape(n_tok, c)
    feats = jnp.take(char_table.astype(jnp.bfloat16), ids_flat, axis=0)
    feats = feats.reshape(n_tok, c * CHAR_EMB)

    # ScalarMix semantics: gamma * sum_k softmax(params)_k * layer_k
    mix_w = (jax.nn.softmax(scalar_params) * gamma).astype(jnp.float32)

    # bf16 matmul operands; halves weight DMA bytes, f32 accum in-kernel.
    w0b = w0.astype(jnp.bfloat16)
    w1b = w1.astype(jnp.bfloat16)
    w2b = w2.astype(jnp.bfloat16)

    # Token tiling: collapse the grid at small scale (all tokens in one step);
    # cap at 256 rows per step at scale.  16-row granularity keeps the bf16
    # (16, 128) sublane tiling / (8, 128) BlockSpec rule satisfied.
    t_tile = min(T_TILE_MAX, _round_up(n_tok, 16))
    n_pad = _round_up(n_tok, t_tile)
    if n_pad != n_tok:
        feats = jnp.pad(feats, ((0, n_pad - n_tok), (0, 0)))

    kwargs = dict(t_tile=t_tile, n_pad=n_pad, out_dtype=out_dtype)
    try:
        out_flat = _pallas_forward(mix_w, feats, w0b, w1b, w2b,
                                   single_buffer_weights=True,
                                   allow_feats_fusion=True, **kwargs)
    except Exception:
        # Defensive: if the installed jax/jaxlib does not support
        # pl.Buffered(1) single-buffering or allow_input_fusion, fall back to
        # the known-good double-buffered, unfused configuration instead of
        # failing the forward pass.
        # TODO(synk): drop once the minimum supported jaxlib guarantees both.
        out_flat = _pallas_forward(mix_w, feats, w0b, w1b, w2b,
                                   single_buffer_weights=False,
                                   allow_feats_fusion=False, **kwargs)

    return out_flat[:n_tok].reshape(b, s, D)


def _reference(character_ids, char_table, w0, w1, w2, scalar_params, gamma):
    """Pure-JAX reference mirroring the kernel numerics (bf16 ops, f32 accum).

    Returns f32; the kernel's bf16 output only adds final-store rounding.
    """
    b, s, c = character_ids.shape
    feats = jnp.take(char_table.astype(jnp.bfloat16),
                     character_ids.reshape(b * s, c), axis=0
                     ).reshape(b * s, c * CHAR_EMB)
    mix_w = jax.nn.softmax(scalar_params) * gamma
    w0b, w1b, w2b = (w.astype(jnp.bfloat16) for w in (w0, w1, w2))
    l0 = jnp.maximum(
        jnp.dot(feats, w0b, preferred_element_type=jnp.float32), 0.0)
    l1 = jnp.tanh(jnp.dot(l0.astype(jnp.bfloat16), w1b,
                          preferred_element_type=jnp.float32))
    l2 = jnp.tanh(jnp.dot(l1.astype(jnp.bfloat16), w2b,
                          preferred_element_type=jnp.float32))
    out = mix_w[0] * l0 + mix_w[1] * l1 + mix_w[2] * l2
    return out.reshape(b, s, D)


if __name__ == "__main__":
    key = jax.random.PRNGKey(0)
    k_ids, k_tab, k_w0, k_w1, k_w2 = jax.random.split(key, 5)

    # deterministic example inputs / synthetic "frozen" parameters
    char_table = jax.random.normal(k_tab, (CHAR_VOCAB, CHAR_EMB),
                                   jnp.float32) * 0.1
    w0 = jax.random.normal(k_w0, (F, D), jnp.float32) / jnp.sqrt(F)
    w1 = jax.random.normal(k_w1, (D, D), jnp.float32) / jnp.sqrt(D)
    w2 = jax.random.normal(k_w2, (D, D), jnp.float32) / jnp.sqrt(D)

    # ScalarMix parameters (trainable in "123" mode); deterministic values here
    scalar_params = jnp.array([0.1, 0.2, 0.3], jnp.float32)
    gamma = jnp.float32(1.5)

    # Main case: B=2, S=8 (16 tokens -> single grid step), bf16 output path.
    character_ids = jax.random.randint(
        k_ids, (B, S, MAX_CHARS), 0, CHAR_VOCAB, dtype=jnp.int32)
    emb = jax.block_until_ready(word_embedding_forward(
        character_ids, char_table, w0, w1, w2, scalar_params, gamma))
    ref = _reference(character_ids, char_table, w0, w1, w2,
                     scalar_params, gamma)
    assert emb.shape == (B, S, D)
    assert emb.dtype == jnp.bfloat16
    assert jnp.allclose(emb.astype(jnp.float32), ref, atol=1e-2, rtol=2e-2)

    # Tail case: non-divisible token count (2*9 = 18 tokens, padded to tile).
    character_ids2 = jax.random.randint(
        k_ids, (B, 9, MAX_CHARS), 0, CHAR_VOCAB, dtype=jnp.int32)
    emb2 = jax.block_until_ready(word_embedding_forward(
        character_ids2, char_table, w0, w1, w2, scalar_params, gamma))
    ref2 = _reference(character_ids2, char_table, w0, w1, w2,
                      scalar_params, gamma)
    assert emb2.shape == (B, 9, D)
    assert jnp.allclose(emb2.astype(jnp.float32), ref2, atol=1e-2, rtol=2e-2)

    # f32-output path (for downstreams that require the module's float dtype).
    emb3 = jax.block_until_ready(word_embedding_forward(
        character_ids, char_table, w0, w1, w2, scalar_params, gamma,
        out_dtype=jnp.float32))
    assert emb3.dtype == jnp.float32
    assert jnp.allclose(emb3, ref, atol=2e-3, rtol=2e-3)

    print("KERNEL_OK")
</pallas_src>

<mosaic_0001>
module attributes {stable_mosaic.version = 11 : i64} {
  func.func @elmo_mix_kernel(%arg0: i32, %arg1: memref<3xf32, #tpu.memory_space<smem>>, %arg2: memref<16x128xbf16, #tpu.memory_space<vmem>>, %arg3: memref<128x128xbf16, #tpu.memory_space<vmem>>, %arg4: memref<128x128xbf16, #tpu.memory_space<vmem>>, %arg5: memref<128x128xbf16, #tpu.memory_space<vmem>>, %arg6: memref<16x128xbf16, #tpu.memory_space<vmem>>) attributes {dimension_semantics = [#tpu.dimension_semantics<parallel>], iteration_bounds = array<i64: 1>, scalar_prefetch = 0 : i64, scratch_operands = 0 : i64, tpu.core_type = #tpu.core_type<tc>, window_params = [{transform_indices = @transform_0, window_bounds = array<i64: 3>}, {transform_indices = @transform_1, window_bounds = array<i64: 16, 128>}, {pipeline_mode = #tpu.pipeline_mode<synchronous>, transform_indices = @transform_2, window_bounds = array<i64: 128, 128>}, {pipeline_mode = #tpu.pipeline_mode<synchronous>, transform_indices = @transform_3, window_bounds = array<i64: 128, 128>}, {pipeline_mode = #tpu.pipeline_mode<synchronous>, transform_indices = @transform_4, window_bounds = array<i64: 128, 128>}, {transform_indices = @transform_5, window_bounds = array<i64: 16, 128>}]} {
    %c0 = arith.constant 0 : index
    %0 = memref.load %arg1[%c0] : memref<3xf32, #tpu.memory_space<smem>>
    %c1 = arith.constant 1 : index
    %1 = memref.load %arg1[%c1] : memref<3xf32, #tpu.memory_space<smem>>
    %c2 = arith.constant 2 : index
    %2 = memref.load %arg1[%c2] : memref<3xf32, #tpu.memory_space<smem>>
    %c0_0 = arith.constant 0 : index
    %c0_1 = arith.constant 0 : index
    %3 = vector.load %arg2[%c0_0, %c0_1] : memref<16x128xbf16, #tpu.memory_space<vmem>>, vector<16x128xbf16>
    %c0_2 = arith.constant 0 : index
    %c0_3 = arith.constant 0 : index
    %4 = vector.load %arg3[%c0_2, %c0_3] : memref<128x128xbf16, #tpu.memory_space<vmem>>, vector<128x128xbf16>
    %cst = arith.constant dense<0.000000e+00> : vector<16x128xf32>
    %5 = tpu.matmul %3, %4, %cst {dimension_numbers = #tpu.dot_dimension_numbers<[1], [0], [0], [1], [0, 0, 1, 1], [], []>} : vector<16x128xbf16>, vector<128x128xbf16>, vector<16x128xf32> -> vector<16x128xf32>
    %cst_4 = arith.constant 0.000000e+00 : f32
    %6 = vector.broadcast %cst_4 : f32 to vector<16x128xf32>
    %7 = arith.maximumf %5, %6 : vector<16x128xf32>
    %8 = vector.broadcast %0 : f32 to vector<16x128xf32>
    %9 = arith.mulf %8, %7 : vector<16x128xf32>
    %10 = arith.truncf %7 : vector<16x128xf32> to vector<16x128xbf16>
    %c0_5 = arith.constant 0 : index
    %c0_6 = arith.constant 0 : index
    %11 = vector.load %arg4[%c0_5, %c0_6] : memref<128x128xbf16, #tpu.memory_space<vmem>>, vector<128x128xbf16>
    %cst_7 = arith.constant dense<0.000000e+00> : vector<16x128xf32>
    %12 = tpu.matmul %10, %11, %cst_7 {dimension_numbers = #tpu.dot_dimension_numbers<[1], [0], [0], [1], [0, 0, 1, 1], [], []>} : vector<16x128xbf16>, vector<128x128xbf16>, vector<16x128xf32> -> vector<16x128xf32>
    %13 = math.tanh %12 : vector<16x128xf32>
    %14 = vector.broadcast %1 : f32 to vector<16x128xf32>
    %15 = arith.mulf %14, %13 : vector<16x128xf32>
    %16 = arith.addf %9, %15 : vector<16x128xf32>
    %17 = arith.truncf %13 : vector<16x128xf32> to vector<16x128xbf16>
    %c0_8 = arith.constant 0 : index
    %c0_9 = arith.constant 0 : index
    %18 = vector.load %arg5[%c0_8, %c0_9] : memref<128x128xbf16, #tpu.memory_space<vmem>>, vector<128x128xbf16>
    %cst_10 = arith.constant dense<0.000000e+00> : vector<16x128xf32>
    %19 = tpu.matmul %17, %18, %cst_10 {dimension_numbers = #tpu.dot_dimension_numbers<[1], [0], [0], [1], [0, 0, 1, 1], [], []>} : vector<16x128xbf16>, vector<128x128xbf16>, vector<16x128xf32> -> vector<16x128xf32>
    %20 = math.tanh %19 : vector<16x128xf32>
    %21 = vector.broadcast %2 : f32 to vector<16x128xf32>
    %22 = arith.mulf %21, %20 : vector<16x128xf32>
    %23 = arith.addf %16, %22 : vector<16x128xf32>
    %24 = arith.truncf %23 : vector<16x128xf32> to vector<16x128xbf16>
    %c0_11 = arith.constant 0 : index
    %c0_12 = arith.constant 0 : index
    %25 = vector.load %arg6[%c0_11, %c0_12] : memref<16x128xbf16, #tpu.memory_space<vmem>>, vector<16x128xbf16>
    tpu.vector_store %arg6[%c0_11, %c0_12], %24 {strides = array<i32>} : memref<16x128xbf16, #tpu.memory_space<vmem>>, vector<16x128xbf16>,
    return
  }
  func.func @transform_0(%arg0: i32) -> i32 {
    %c0_i32 = arith.constant 0 : i32
    %c0_i32_0 = arith.constant 0 : i32
    return %c0_i32 : i32
  }
  func.func @transform_1(%arg0: i32) -> (i32, i32) {
    %c0_i32 = arith.constant 0 : i32
    %c0_i32_0 = arith.constant 0 : i32
    return %arg0, %c0_i32 : i32, i32
  }
  func.func @transform_2(%arg0: i32) -> (i32, i32) {
    %c0_i32 = arith.constant 0 : i32
    %c0_i32_0 = arith.constant 0 : i32
    %c0_i32_1 = arith.constant 0 : i32
    return %c0_i32, %c0_i32_0 : i32, i32
  }
  func.func @transform_3(%arg0: i32) -> (i32, i32) {
    %c0_i32 = arith.constant 0 : i32
    %c0_i32_0 = arith.constant 0 : i32
    %c0_i32_1 = arith.constant 0 : i32
    return %c0_i32, %c0_i32_0 : i32, i32
  }
  func.func @transform_4(%arg0: i32) -> (i32, i32) {
    %c0_i32 = arith.constant 0 : i32
    %c0_i32_0 = arith.constant 0 : i32
    %c0_i32_1 = arith.constant 0 : i32
    return %c0_i32, %c0_i32_0 : i32, i32
  }
  func.func @transform_5(%arg0: i32) -> (i32, i32) {
    %c0_i32 = arith.constant 0 : i32
    %c0_i32_0 = arith.constant 0 : i32
    return %arg0, %c0_i32 : i32, i32
  }
}

module attributes {stable_mosaic.version = 11 : i64} {
  func.func @elmo_mix_kernel(%arg0: i32, %arg1: memref<3xf32, #tpu.memory_space<smem>>, %arg2: memref<16x128xbf16, #tpu.memory_space<vmem>>, %arg3: memref<128x128xbf16, #tpu.memory_space<vmem>>, %arg4: memref<128x128xbf16, #tpu.memory_space<vmem>>, %arg5: memref<128x128xbf16, #tpu.memory_space<vmem>>, %arg6: memref<16x128xbf16, #tpu.memory_space<vmem>>) attributes {dimension_semantics = [#tpu.dimension_semantics<parallel>], iteration_bounds = array<i64: 1>, scalar_prefetch = 0 : i64, scratch_operands = 0 : i64, tpu.core_type = #tpu.core_type<tc>, window_params = [{transform_indices = @transform_0, window_bounds = array<i64: 3>}, {transform_indices = @transform_1, window_bounds = array<i64: 16, 128>}, {pipeline_mode = #tpu.pipeline_mode<synchronous>, transform_indices = @transform_2, window_bounds = array<i64: 128, 128>}, {pipeline_mode = #tpu.pipeline_mode<synchronous>, transform_indices = @transform_3, window_bounds = array<i64: 128, 128>}, {pipeline_mode = #tpu.pipeline_mode<synchronous>, transform_indices = @transform_4, window_bounds = array<i64: 128, 128>}, {transform_indices = @transform_5, window_bounds = array<i64: 16, 128>}]} {
    %c0 = arith.constant 0 : index
    %0 = memref.load %arg1[%c0] : memref<3xf32, #tpu.memory_space<smem>>
    %c1 = arith.constant 1 : index
    %1 = memref.load %arg1[%c1] : memref<3xf32, #tpu.memory_space<smem>>
    %c2 = arith.constant 2 : index
    %2 = memref.load %arg1[%c2] : memref<3xf32, #tpu.memory_space<smem>>
    %c0_0 = arith.constant 0 : index
    %c0_1 = arith.constant 0 : index
    %3 = vector.load %arg2[%c0_0, %c0_1] : memref<16x128xbf16, #tpu.memory_space<vmem>>, vector<16x128xbf16>
    %c0_2 = arith.constant 0 : index
    %c0_3 = arith.constant 0 : index
    %4 = vector.load %arg3[%c0_2, %c0_3] : memref<128x128xbf16, #tpu.memory_space<vmem>>, vector<128x128xbf16>
    %cst = arith.constant dense<0.000000e+00> : vector<16x128xf32>
    %5 = tpu.matmul %3, %4, %cst {dimension_numbers = #tpu.dot_dimension_numbers<[1], [0], [0], [1], [0, 0, 1, 1], [], []>} : vector<16x128xbf16>, vector<128x128xbf16>, vector<16x128xf32> -> vector<16x128xf32>
    %cst_4 = arith.constant 0.000000e+00 : f32
    %6 = vector.broadcast %cst_4 : f32 to vector<16x128xf32>
    %7 = arith.maximumf %5, %6 : vector<16x128xf32>
    %8 = vector.broadcast %0 : f32 to vector<16x128xf32>
    %9 = arith.mulf %8, %7 : vector<16x128xf32>
    %10 = arith.truncf %7 : vector<16x128xf32> to vector<16x128xbf16>
    %c0_5 = arith.constant 0 : index
    %c0_6 = arith.constant 0 : index
    %11 = vector.load %arg4[%c0_5, %c0_6] : memref<128x128xbf16, #tpu.memory_space<vmem>>, vector<128x128xbf16>
    %cst_7 = arith.constant dense<0.000000e+00> : vector<16x128xf32>
    %12 = tpu.matmul %10, %11, %cst_7 {dimension_numbers = #tpu.dot_dimension_numbers<[1], [0], [0], [1], [0, 0, 1, 1], [], []>} : vector<16x128xbf16>, vector<128x128xbf16>, vector<16x128xf32> -> vector<16x128xf32>
    %13 = math.tanh %12 : vector<16x128xf32>
    %14 = vector.broadcast %1 : f32 to vector<16x128xf32>
    %15 = arith.mulf %14, %13 : vector<16x128xf32>
    %16 = arith.addf %9, %15 : vector<16x128xf32>
    %17 = arith.truncf %13 : vector<16x128xf32> to vector<16x128xbf16>
    %c0_8 = arith.constant 0 : index
    %c0_9 = arith.constant 0 : index
    %18 = vector.load %arg5[%c0_8, %c0_9] : memref<128x128xbf16, #tpu.memory_space<vmem>>, vector<128x128xbf16>
    %cst_10 = arith.constant dense<0.000000e+00> : vector<16x128xf32>
    %19 = tpu.matmul %17, %18, %cst_10 {dimension_numbers = #tpu.dot_dimension_numbers<[1], [0], [0], [1], [0, 0, 1, 1], [], []>} : vector<16x128xbf16>, vector<128x128xbf16>, vector<16x128xf32> -> vector<16x128xf32>
    %20 = math.tanh %19 : vector<16x128xf32>
    %21 = vector.broadcast %2 : f32 to vector<16x128xf32>
    %22 = arith.mulf %21, %20 : vector<16x128xf32>
    %23 = arith.addf %16, %22 : vector<16x128xf32>
    %24 = arith.truncf %23 : vector<16x128xf32> to vector<16x128xbf16>
    %c0_11 = arith.constant 0 : index
    %c0_12 = arith.constant 0 : index
    %25 = vector.load %arg6[%c0_11, %c0_12] : memref<16x128xbf16, #tpu.memory_space<vmem>>, vector<16x128xbf16>
    tpu.vector_store %arg6[%c0_11, %c0_12], %24 {strides = array<i32>} : memref<16x128xbf16, #tpu.memory_space<vmem>>, vector<16x128xbf16>,
    return
  }
  func.func @transform_0(%arg0: i32) -> i32 {
    %c0_i32 = arith.constant 0 : i32
    %c0_i32_0 = arith.constant 0 : i32
    return %c0_i32 : i32
  }
  func.func @transform_1(%arg0: i32) -> (i32, i32) {
    %c0_i32 = arith.constant 0 : i32
    %c0_i32_0 = arith.constant 0 : i32
    return %arg0, %c0_i32 : i32, i32
  }
  func.func @transform_2(%arg0: i32) -> (i32, i32) {
    %c0_i32 = arith.constant 0 : i32
    %c0_i32_0 = arith.constant 0 : i32
    %c0_i32_1 = arith.constant 0 : i32
    return %c0_i32, %c0_i32_0 : i32, i32
  }
  func.func @transform_3(%arg0: i32) -> (i32, i32) {
    %c0_i32 = arith.constant 0 : i32
    %c0_i32_0 = arith.constant 0 : i32
    %c0_i32_1 = arith.constant 0 : i32
    return %c0_i32, %c0_i32_0 : i32, i32
  }
  func.func @transform_4(%arg0: i32) -> (i32, i32) {
    %c0_i32 = arith.constant 0 : i32
    %c0_i32_0 = arith.constant 0 : i32
    %c0_i32_1 = arith.constant 0 : i32
    return %c0_i32, %c0_i32_0 : i32, i32
  }
  func.func @transform_5(%arg0: i32) -> (i32, i32) {
    %c0_i32 = arith.constant 0 : i32
    %c0_i32_0 = arith.constant 0 : i32
    return %arg0, %c0_i32 : i32, i32
  }
}

</mosaic_0001>

<bundles_post_ra>
// kernel: tpu_custom_call.1
= control target key start
LH: loop header
LB: loop body
LE: loop exit
PB: predicated region body
PF: predicated region fallthrough
CT: control target
= control target key end

     0   :  { %10 = vsyncpa [#allocation5], 0  ;;  %s750_s0 = inlined_call_operand.hbm [shape: f32[3], index: 0, kind: input, shape index: {}]   ;;  %s751_s1 = inlined_call_operand.hbm [shape: bf16[16,128], index: 1, kind: input, shape index: {}]   ;;  %s752_s2 = inlined_call_operand.hbm [shape: bf16[128,128], index: 2, kind: input, shape index: {}]   ;;  %s753_s3 = inlined_call_operand.hbm [shape: bf16[128,128], index: 3, kind: input, shape index: {}]   ;;  %s754_s4 = inlined_call_operand.hbm [shape: bf16[128,128], index: 4, kind: input, shape index: {}]   ;;  %s755_s5 = inlined_call_operand.hbm [shape: bf16[16,128], index: 5, kind: output, shape index: {}]  }
   0x1   :  { %11 = vsyncpa [#allocation3], 0 }
   0x2   :  { %12 = vsyncpa [#allocation8], 0 }
   0x3   :  { %13 = vsyncpa [#allocation11], 0 }
   0x4   :  { %14 = vsyncpa [#allocation4], 0  ;;  %s41_s20 = sshll.u32 %s752_s2, 4  ;;  %s679_s21 = smov [#allocation7]   ;;  %s42_s20 = int_to_ptr.hbm [resolvable:$true] %s41_s20 }
   0x5   :  { %s43_s22 = sshll.u32 %s679_s21, 4  ;;  %s20_s25 = sshll.u32 %s750_s0, 4  ;;  %s44_s22 = int_to_ptr.vmem [resolvable:$true] %s43_s22  ;;  %s21_s25 = int_to_ptr.hbm [resolvable:$true] %s20_s25 }
   0x6   :  { %s680_s26 = smov 64   ;;  %s681_s27 = smov 4  }
   0x7   :  { %49 = dma.hbm_to_vmem [thread:$0]  %s42_s20, 1024, %s44_s22, [#allocation8], %s680_s26, %s680_s26, %s681_s27  }
   0x8   :  { %s682_s28 = smov [#allocation2]   ;;  %s28_s2 = sshll.u32 %s751_s1, 4  ;;  %s29_s2 = int_to_ptr.hbm [resolvable:$true] %s28_s2 }
   0x9   :  { %23 = dma.hbm_to_smem %s21_s25, 16, %s682_s28, [#allocation5]  }
   0xa   :  { %s683_s6 = smov [#allocation6]   ;;  %s54_s0 = sshll.u32 %s753_s3, 4  ;;  %s55_s0 = int_to_ptr.hbm [resolvable:$true] %s54_s0 }
   0xb   :  { %s30_s7 = sshll.u32 %s683_s6, 4  ;;  %s684_s10 = smov [#allocation9]   ;;  %s31_s7 = int_to_ptr.vmem [resolvable:$true] %s30_s7 }
   0xc   :  { %36 = dma.hbm_to_vmem [thread:$0]  %s29_s2, 128, %s31_s7, [#allocation3], %s680_s26, %s680_s26, %s681_s27  }
   0xd   :  { %s56_s11 = sshll.u32 %s684_s10, 4  ;;  %s67_s14 = sshll.u32 %s754_s4, 4  ;;  %s57_s11 = int_to_ptr.vmem [resolvable:$true] %s56_s11  ;;  %s68_s14 = int_to_ptr.hbm [resolvable:$true] %s67_s14 }
   0xe   :  { %62 = dma.hbm_to_vmem [thread:$0]  %s55_s0, 1024, %s57_s11, [#allocation8], %s680_s26, %s680_s26, %s681_s27  }
   0xf   :  { %s685_s1 = smov [#allocation10]  }
  0x10   :  { %s69_s15 = sshll.u32 %s685_s1, 4  ;;  %s70_s15 = int_to_ptr.vmem [resolvable:$true] %s69_s15 }
  0x11   :  { %75 = dma.hbm_to_vmem [thread:$0]  %s68_s14, 1024, %s70_s15, [#allocation11], %s680_s26, %s680_s26, %s681_s27  }
  0x12   :  { %669 = dma.done.wait [#allocation5], 16  }
  0x13   :  { %670 = vsyncadd [#allocation5], 4294967280 }
  0x14   :  { %671 = dma.done.wait [#allocation3], 128  }
  0x15   :  { %672 = vsyncadd [#allocation3], 4294967168 }
  0x16   :  { %673 = dma.done.wait [#allocation8], 2048  }
  0x17   :  { %674 = vsyncadd [#allocation8], 4294965248 }
  0x18   :  { %675 = dma.done.wait [#allocation11], 1024  }
  0x19   :  { %676 = vsyncadd [#allocation11], 4294966272 }
  0x1a   :  { %96 = sfence }
  0x1b   :  { %v499_v0 = vld [vmem:[#allocation7 + $0x38] sm:$0xff]  ;;  %v498_v1 = vld [vmem:[#allocation7 + $0x30] sm:$0xff]  ;;  %v497_v4 = vld [vmem:[#allocation7 + $0x28] sm:$0xff]  ;;  %s97_s3 = sld [smem:[#allocation2]]  ;;  %s686_s17 = smov [#allocation12]  }
  0x1c   :  { %172 = vmatpush.bf16.msra.mxu0 %v499_v0  ;;  %v507_v2 = vld [vmem:[#allocation9 + $0x38] sm:$0xff]  ;;  %v506_v3 = vld [vmem:[#allocation9 + $0x30] sm:$0xff]  ;;  %v505_v5 = vld [vmem:[#allocation9 + $0x28] sm:$0xff]  ;;  %s389_s4 = sld [smem:[#allocation2 + $0x1]]  ;;  %s371_s18 = sshll.u32 %s686_s17, 4  ;;  %s372_s18 = int_to_ptr.vmem [resolvable:$true] %s371_s18 }
  0x1d   :  { %256 = vmatpush.bf16.msra.mxu1 %v507_v2  ;;  %v496_v6 = vld [vmem:[#allocation7 + $0x20] sm:$0xff]  ;;  %v495_v8 = vld [vmem:[#allocation7 + $0x18] sm:$0xff]  ;;  %v494_v10 = vld [vmem:[#allocation7 + $0x10] sm:$0xff]  ;;  %s390_s16 = sld [smem:[#allocation2 + $0x2]]  ;;  %s373_s21 = sshll.u32 %s755_s5, 4  ;;  %s374_s21 = int_to_ptr.hbm [resolvable:$true] %s373_s21 }
  0x1e   :  { %v504_v7 = vld [vmem:[#allocation9 + $0x20] sm:$0xff]  ;;  %v503_v9 = vld [vmem:[#allocation9 + $0x18] sm:$0xff]  ;;  %v493_v11 = vld [vmem:[#allocation7 + $0x8] sm:$0xff] }
  0x1f   :  { %v492_v12 = vld [vmem:[#allocation7] sm:$0xff]  ;;  %v491_v13 = vld [vmem:[#allocation6] sm:$0xff]  ;;  %v502_v14 = vld [vmem:[#allocation9 + $0x10] sm:$0xff] }
  0x20   :  { %173 = vmatpush.bf16.msra.mxu0 %v498_v1  ;;  %v501_v15 = vld [vmem:[#allocation9 + $0x8] sm:$0xff]  ;;  %v500_v16 = vld [vmem:[#allocation9] sm:$0xff]  ;;  %v515_v17 = vld [vmem:[#allocation10 + $0x38] sm:$0xff] }
  0x21   :  { %257 = vmatpush.bf16.msra.mxu1 %v506_v3  ;;  %342 = vmatpush.bf16.msra.mxu2 %v515_v17  ;;  %v514_v18 = vld [vmem:[#allocation10 + $0x30] sm:$0xff]  ;;  %v513_v19 = vld [vmem:[#allocation10 + $0x28] sm:$0xff]  ;;  %v512_v20 = vld [vmem:[#allocation10 + $0x20] sm:$0xff]  ;;  %v188_v31 = vstv %s97_s3 }
  0x22   :  { %v511_v26 = vld [vmem:[#allocation10 + $0x18] sm:$0xff]  ;;  %v510_v27 = vld [vmem:[#allocation10 + $0x10] sm:$0xff]  ;;  %v509_v28 = vld [vmem:[#allocation10 + $0x8] sm:$0xff]  ;;  %v272_v32 = vstv %s389_s4 }
  0x23   :  { %v508_v29 = vld [vmem:[#allocation10] sm:$0xff]  ;;  %v358_v46 = vstv %s390_s16 }
  0x24   :  { %174 = vmatpush.bf16.msra.mxu0 %v497_v4 }
  0x25   :  { %258 = vmatpush.bf16.msra.mxu1 %v505_v5  ;;  %343 = vmatpush.bf16.msra.mxu2 %v514_v18 }
  0x28   :  { %175 = vmatpush.bf16.msra.mxu0 %v496_v6 }
  0x29   :  { %259 = vmatpush.bf16.msra.mxu1 %v504_v7  ;;  %344 = vmatpush.bf16.msra.mxu2 %v513_v19 }
  0x2c   :  { %176 = vmatpush.bf16.msra.mxu0 %v495_v8 }
  0x2d   :  { %260 = vmatpush.bf16.msra.mxu1 %v503_v9  ;;  %345 = vmatpush.bf16.msra.mxu2 %v512_v20 }
  0x30   :  { %177 = vmatpush.bf16.msra.mxu0 %v494_v10 }
  0x31   :  { %261 = vmatpush.bf16.msra.mxu1 %v502_v14  ;;  %346 = vmatpush.bf16.msra.mxu2 %v511_v26 }
  0x34   :  { %178 = vmatpush.bf16.msra.mxu0 %v493_v11 }
  0x35   :  { %262 = vmatpush.bf16.msra.mxu1 %v501_v15  ;;  %347 = vmatpush.bf16.msra.mxu2 %v510_v27 }
  0x38   :  { %179 = vmatpush.bf16.msra.mxu0 %v492_v12 }
  0x39   :  { %263 = vmatpush.bf16.msra.mxu1 %v500_v16  ;;  %348 = vmatpush.bf16.msra.mxu2 %v509_v28 }
  0x3b   :  { %180 = vmatmul.bf16.vlgmr.msra.gmra.mxu0 %v491_v13 }
  0x3d   :  { %349 = vmatpush.bf16.msra.mxu2 %v508_v29 }
  0xb8   :  { %v181_v21 = vpop.f32.mrf.mxu0 }
  0xb9   :  { %v186_v23 = vmax.f32 %v181_v21, 0.0 }
  0xbb   :  { %v189_v34 = vmul.f32 %v188_v31, %v186_v23 }
  0xc0   :  { %v183_v22 = vpop.f32.mrf.mxu0 }
  0xc1   :  { %v187_v24 = vmax.f32 %v183_v22, 0.0 }
  0xc3   :  { %v191_v25 = vpack.c.bf16 %v187_v24, %v186_v23  ;;  %v190_v39 = vmul.f32 %v188_v31, %v187_v24 }
  0xc5   :  { %264 = vmatmul.bf16.vlgmr.msra.gmra.mxu1 %v191_v25 }
 0x142   :  { %v265_v30 = vpop.f32.mrf.mxu1 }
 0x143   :  { %529 = vtanh.f32 %v265_v30 }
 0x149   :  { %v530_v33 = vpop.eup %529 }
 0x14a   :  { %v273_v35 = vmul.f32 %v530_v33, %v272_v32  ;;  %v267_v36 = vpop.f32.mrf.mxu1 }
 0x14b   :  { %531 = vtanh.f32 %v267_v36 }
 0x14c   :  { %v275_v37 = vadd.f32 %v273_v35, %v189_v34 }
 0x151   :  { %v532_v38 = vpop.eup %531 }
 0x152   :  { %v274_v40 = vmul.f32 %v532_v38, %v272_v32  ;;  %v277_v41 = vpack.c.bf16 %v532_v38, %v530_v33 }
 0x154   :  { %350 = vmatmul.bf16.vlgmr.msra.gmra.mxu2 %v277_v41  ;;  %v276_v42 = vadd.f32 %v274_v40, %v190_v39 }
 0x1d7   :  { %v351_v43 = vpop.f32.mrf.mxu2 }
 0x1d8   :  { %533 = vtanh.f32 %v351_v43 }
 0x1de   :  { %v534_v45 = vpop.eup %533 }
 0x1df   :  { %v353_v44 = vpop.f32.mrf.mxu2  ;;  %v359_v47 = vmul.f32 %v534_v45, %v358_v46 }
 0x1e0   :  { %535 = vtanh.f32 %v353_v44 }
 0x1e1   :  { %v361_v50 = vadd.f32 %v359_v47, %v275_v37 }
 0x1e6   :  { %v536_v48 = vpop.eup %535 }
 0x1e7   :  { %v360_v49 = vmul.f32 %v536_v48, %v358_v46 }
 0x1e9   :  { %v362_v51 = vadd.f32 %v360_v49, %v276_v42 }
 0x1eb   :  { %v519_v52 = vpack.c.bf16 %v362_v51, %v361_v50 }
 0x1ed   :  { %520 = vst [vmem:[#allocation12] sm:$0xff] %v519_v52  }
 0x1ee   :  { %379 = dma.vmem_to_hbm [thread:$0]  %s372_s18, 128, %s374_s21, [#allocation4], %s680_s26, %s680_s26, %s681_s27  }
 0x1ef   :  { %677 = dma.done.wait [#allocation4], 128  }
 0x1f0   :  { %678 = vsyncadd [#allocation4], 4294967168 }
 0x1f1   :  { %384 = vsyncpa [#allocation3], 1 }
 0x1f2   :  { %385 = vsyncpa [#allocation8], 1 }
 0x1f3   :  { %386 = vsyncpa [#allocation11], 1 }
 0x1f4   :  { %387 = vsyncpa [#allocation4], 1 }
 0x1f5   :  { %388 = vsyncpa [#allocation5], 1 }

// kernel: tpu_custom_call.1
= control target key start
LH: loop header
LB: loop body
LE: loop exit
PB: predicated region body
PF: predicated region fallthrough
CT: control target
= control target key end

     0   :  { %10 = vsyncpa [#allocation5], 0  ;;  %s750_s0 = inlined_call_operand.hbm [shape: f32[3], index: 0, kind: input, shape index: {}]   ;;  %s751_s1 = inlined_call_operand.hbm [shape: bf16[16,128], index: 1, kind: input, shape index: {}]   ;;  %s752_s2 = inlined_call_operand.hbm [shape: bf16[128,128], index: 2, kind: input, shape index: {}]   ;;  %s753_s3 = inlined_call_operand.hbm [shape: bf16[128,128], index: 3, kind: input, shape index: {}]   ;;  %s754_s4 = inlined_call_operand.hbm [shape: bf16[128,128], index: 4, kind: input, shape index: {}]   ;;  %s755_s5 = inlined_call_operand.hbm [shape: bf16[16,128], index: 5, kind: output, shape index: {}]  }
   0x1   :  { %11 = vsyncpa [#allocation3], 0 }
   0x2   :  { %12 = vsyncpa [#allocation8], 0 }
   0x3   :  { %13 = vsyncpa [#allocation11], 0 }
   0x4   :  { %14 = vsyncpa [#allocation4], 0  ;;  %s41_s20 = sshll.u32 %s752_s2, 4  ;;  %s679_s21 = smov [#allocation7]   ;;  %s42_s20 = int_to_ptr.hbm [resolvable:$true] %s41_s20 }
   0x5   :  { %s43_s22 = sshll.u32 %s679_s21, 4  ;;  %s20_s25 = sshll.u32 %s750_s0, 4  ;;  %s44_s22 = int_to_ptr.vmem [resolvable:$true] %s43_s22  ;;  %s21_s25 = int_to_ptr.hbm [resolvable:$true] %s20_s25 }
   0x6   :  { %s680_s26 = smov 64   ;;  %s681_s27 = smov 4  }
   0x7   :  { %49 = dma.hbm_to_vmem [thread:$0]  %s42_s20, 1024, %s44_s22, [#allocation8], %s680_s26, %s680_s26, %s681_s27  }
   0x8   :  { %s682_s28 = smov [#allocation2]   ;;  %s28_s2 = sshll.u32 %s751_s1, 4  ;;  %s29_s2 = int_to_ptr.hbm [resolvable:$true] %s28_s2 }
   0x9   :  { %23 = dma.hbm_to_smem %s21_s25, 16, %s682_s28, [#allocation5]  }
   0xa   :  { %s683_s6 = smov [#allocation6]   ;;  %s54_s0 = sshll.u32 %s753_s3, 4  ;;  %s55_s0 = int_to_ptr.hbm [resolvable:$true] %s54_s0 }
   0xb   :  { %s30_s7 = sshll.u32 %s683_s6, 4  ;;  %s684_s10 = smov [#allocation9]   ;;  %s31_s7 = int_to_ptr.vmem [resolvable:$true] %s30_s7 }
   0xc   :  { %36 = dma.hbm_to_vmem [thread:$0]  %s29_s2, 128, %s31_s7, [#allocation3], %s680_s26, %s680_s26, %s681_s27  }
   0xd   :  { %s56_s11 = sshll.u32 %s684_s10, 4  ;;  %s67_s14 = sshll.u32 %s754_s4, 4  ;;  %s57_s11 = int_to_ptr.vmem [resolvable:$true] %s56_s11  ;;  %s68_s14 = int_to_ptr.hbm [resolvable:$true] %s67_s14 }
   0xe   :  { %62 = dma.hbm_to_vmem [thread:$0]  %s55_s0, 1024, %s57_s11, [#allocation8], %s680_s26, %s680_s26, %s681_s27  }
   0xf   :  { %s685_s1 = smov [#allocation10]  }
  0x10   :  { %s69_s15 = sshll.u32 %s685_s1, 4  ;;  %s70_s15 = int_to_ptr.vmem [resolvable:$true] %s69_s15 }
  0x11   :  { %75 = dma.hbm_to_vmem [thread:$0]  %s68_s14, 1024, %s70_s15, [#allocation11], %s680_s26, %s680_s26, %s681_s27  }
  0x12   :  { %669 = dma.done.wait [#allocation5], 16  }
  0x13   :  { %670 = vsyncadd [#allocation5], 4294967280 }
  0x14   :  { %671 = dma.done.wait [#allocation3], 128  }
  0x15   :  { %672 = vsyncadd [#allocation3], 4294967168 }
  0x16   :  { %673 = dma.done.wait [#allocation8], 2048  }
  0x17   :  { %674 = vsyncadd [#allocation8], 4294965248 }
  0x18   :  { %675 = dma.done.wait [#allocation11], 1024  }
  0x19   :  { %676 = vsyncadd [#allocation11], 4294966272 }
  0x1a   :  { %96 = sfence }
  0x1b   :  { %v499_v0 = vld [vmem:[#allocation7 + $0x38] sm:$0xff]  ;;  %v498_v1 = vld [vmem:[#allocation7 + $0x30] sm:$0xff]  ;;  %v497_v4 = vld [vmem:[#allocation7 + $0x28] sm:$0xff]  ;;  %s97_s3 = sld [smem:[#allocation2]]  ;;  %s686_s17 = smov [#allocation12]  }
  0x1c   :  { %172 = vmatpush.bf16.msra.mxu0 %v499_v0  ;;  %v507_v2 = vld [vmem:[#allocation9 + $0x38] sm:$0xff]  ;;  %v506_v3 = vld [vmem:[#allocation9 + $0x30] sm:$0xff]  ;;  %v505_v5 = vld [vmem:[#allocation9 + $0x28] sm:$0xff]  ;;  %s389_s4 = sld [smem:[#allocation2 + $0x1]]  ;;  %s371_s18 = sshll.u32 %s686_s17, 4  ;;  %s372_s18 = int_to_ptr.vmem [resolvable:$true] %s371_s18 }
  0x1d   :  { %256 = vmatpush.bf16.msra.mxu1 %v507_v2  ;;  %v496_v6 = vld [vmem:[#allocation7 + $0x20] sm:$0xff]  ;;  %v495_v8 = vld [vmem:[#allocation7 + $0x18] sm:$0xff]  ;;  %v494_v10 = vld [vmem:[#allocation7 + $0x10] sm:$0xff]  ;;  %s390_s16 = sld [smem:[#allocation2 + $0x2]]  ;;  %s373_s21 = sshll.u32 %s755_s5, 4  ;;  %s374_s21 = int_to_ptr.hbm [resolvable:$true] %s373_s21 }
  0x1e   :  { %v504_v7 = vld [vmem:[#allocation9 + $0x20] sm:$0xff]  ;;  %v503_v9 = vld [vmem:[#allocation9 + $0x18] sm:$0xff]  ;;  %v493_v11 = vld [vmem:[#allocation7 + $0x8] sm:$0xff] }
  0x1f   :  { %v492_v12 = vld [vmem:[#allocation7] sm:$0xff]  ;;  %v491_v13 = vld [vmem:[#allocation6] sm:$0xff]  ;;  %v502_v14 = vld [vmem:[#allocation9 + $0x10] sm:$0xff] }
  0x20   :  { %173 = vmatpush.bf16.msra.mxu0 %v498_v1  ;;  %v501_v15 = vld [vmem:[#allocation9 + $0x8] sm:$0xff]  ;;  %v500_v16 = vld [vmem:[#allocation9] sm:$0xff]  ;;  %v515_v17 = vld [vmem:[#allocation10 + $0x38] sm:$0xff] }
  0x21   :  { %257 = vmatpush.bf16.msra.mxu1 %v506_v3  ;;  %342 = vmatpush.bf16.msra.mxu2 %v515_v17  ;;  %v514_v18 = vld [vmem:[#allocation10 + $0x30] sm:$0xff]  ;;  %v513_v19 = vld [vmem:[#allocation10 + $0x28] sm:$0xff]  ;;  %v512_v20 = vld [vmem:[#allocation10 + $0x20] sm:$0xff]  ;;  %v188_v31 = vstv %s97_s3 }
  0x22   :  { %v511_v26 = vld [vmem:[#allocation10 + $0x18] sm:$0xff]  ;;  %v510_v27 = vld [vmem:[#allocation10 + $0x10] sm:$0xff]  ;;  %v509_v28 = vld [vmem:[#allocation10 + $0x8] sm:$0xff]  ;;  %v272_v32 = vstv %s389_s4 }
  0x23   :  { %v508_v29 = vld [vmem:[#allocation10] sm:$0xff]  ;;  %v358_v46 = vstv %s390_s16 }
  0x24   :  { %174 = vmatpush.bf16.msra.mxu0 %v497_v4 }
  0x25   :  { %258 = vmatpush.bf16.msra.mxu1 %v505_v5  ;;  %343 = vmatpush.bf16.msra.mxu2 %v514_v18 }
  0x28   :  { %175 = vmatpush.bf16.msra.mxu0 %v496_v6 }
  0x29   :  { %259 = vmatpush.bf16.msra.mxu1 %v504_v7  ;;  %344 = vmatpush.bf16.msra.mxu2 %v513_v19 }
  0x2c   :  { %176 = vmatpush.bf16.msra.mxu0 %v495_v8 }
  0x2d   :  { %260 = vmatpush.bf16.msra.mxu1 %v503_v9  ;;  %345 = vmatpush.bf16.msra.mxu2 %v512_v20 }
  0x30   :  { %177 = vmatpush.bf16.msra.mxu0 %v494_v10 }
  0x31   :  { %261 = vmatpush.bf16.msra.mxu1 %v502_v14  ;;  %346 = vmatpush.bf16.msra.mxu2 %v511_v26 }
  0x34   :  { %178 = vmatpush.bf16.msra.mxu0 %v493_v11 }
  0x35   :  { %262 = vmatpush.bf16.msra.mxu1 %v501_v15  ;;  %347 = vmatpush.bf16.msra.mxu2 %v510_v27 }
  0x38   :  { %179 = vmatpush.bf16.msra.mxu0 %v492_v12 }
  0x39   :  { %263 = vmatpush.bf16.msra.mxu1 %v500_v16  ;;  %348 = vmatpush.bf16.msra.mxu2 %v509_v28 }
  0x3b   :  { %180 = vmatmul.bf16.vlgmr.msra.gmra.mxu0 %v491_v13 }
  0x3d   :  { %349 = vmatpush.bf16.msra.mxu2 %v508_v29 }
  0xb8   :  { %v181_v21 = vpop.f32.mrf.mxu0 }
  0xb9   :  { %v186_v23 = vmax.f32 %v181_v21, 0.0 }
  0xbb   :  { %v189_v34 = vmul.f32 %v188_v31, %v186_v23 }
  0xc0   :  { %v183_v22 = vpop.f32.mrf.mxu0 }
  0xc1   :  { %v187_v24 = vmax.f32 %v183_v22, 0.0 }
  0xc3   :  { %v191_v25 = vpack.c.bf16 %v187_v24, %v186_v23  ;;  %v190_v39 = vmul.f32 %v188_v31, %v187_v24 }
  0xc5   :  { %264 = vmatmul.bf16.vlgmr.msra.gmra.mxu1 %v191_v25 }
 0x142   :  { %v265_v30 = vpop.f32.mrf.mxu1 }
 0x143   :  { %529 = vtanh.f32 %v265_v30 }
 0x149   :  { %v530_v33 = vpop.eup %529 }
 0x14a   :  { %v273_v35 = vmul.f32 %v530_v33, %v272_v32  ;;  %v267_v36 = vpop.f32.mrf.mxu1 }
 0x14b   :  { %531 = vtanh.f32 %v267_v36 }
 0x14c   :  { %v275_v37 = vadd.f32 %v273_v35, %v189_v34 }
 0x151   :  { %v532_v38 = vpop.eup %531 }
 0x152   :  { %v274_v40 = vmul.f32 %v532_v38, %v272_v32  ;;  %v277_v41 = vpack.c.bf16 %v532_v38, %v530_v33 }
 0x154   :  { %350 = vmatmul.bf16.vlgmr.msra.gmra.mxu2 %v277_v41  ;;  %v276_v42 = vadd.f32 %v274_v40, %v190_v39 }
 0x1d7   :  { %v351_v43 = vpop.f32.mrf.mxu2 }
 0x1d8   :  { %533 = vtanh.f32 %v351_v43 }
 0x1de   :  { %v534_v45 = vpop.eup %533 }
 0x1df   :  { %v353_v44 = vpop.f32.mrf.mxu2  ;;  %v359_v47 = vmul.f32 %v534_v45, %v358_v46 }
 0x1e0   :  { %535 = vtanh.f32 %v353_v44 }
 0x1e1   :  { %v361_v50 = vadd.f32 %v359_v47, %v275_v37 }
 0x1e6   :  { %v536_v48 = vpop.eup %535 }
 0x1e7   :  { %v360_v49 = vmul.f32 %v536_v48, %v358_v46 }
 0x1e9   :  { %v362_v51 = vadd.f32 %v360_v49, %v276_v42 }
 0x1eb   :  { %v519_v52 = vpack.c.bf16 %v362_v51, %v361_v50 }
 0x1ed   :  { %520 = vst [vmem:[#allocation12] sm:$0xff] %v519_v52  }
 0x1ee   :  { %379 = dma.vmem_to_hbm [thread:$0]  %s372_s18, 128, %s374_s21, [#allocation4], %s680_s26, %s680_s26, %s681_s27  }
 0x1ef   :  { %677 = dma.done.wait [#allocation4], 128  }
 0x1f0   :  { %678 = vsyncadd [#allocation4], 4294967168 }
 0x1f1   :  { %384 = vsyncpa [#allocation3], 1 }
 0x1f2   :  { %385 = vsyncpa [#allocation8], 1 }
 0x1f3   :  { %386 = vsyncpa [#allocation11], 1 }
 0x1f4   :  { %387 = vsyncpa [#allocation4], 1 }
 0x1f5   :  { %388 = vsyncpa [#allocation5], 1 }

</bundles_post_ra>
